<compile_context>
chip_gen: v7x
topology: tpu7x:2x2x1
jax: 0.10.0
libtpu: 0.0.40
codegen_flags: <defaults>
</compile_context>

<pallas_src>
import math

import jax
import jax.numpy as jnp
from jax import lax
from jax.experimental import pallas as pl
from jax.experimental.pallas import tpu as pltpu


def _round_up(x, m):
    return ((x + m - 1) // m) * m


def _elu(x):
    # F.elu(alpha=1): x for x > 0, exp(x) - 1 otherwise.  min() keeps the
    # inactive branch finite for large positive x.
    return jnp.where(x > 0, x, jnp.exp(jnp.minimum(x, 0.0)) - 1.0)


# ---------------------------------------------------------------------------
# Kernel: one (tm, N) row tile per grid step, natural (rows, features) layout.
#   h = elu(x @ W1^T + b1);   out = x + h @ W2^T + b2   (W in PyTorch (out,in))
# Weights/biases are grid-resident (constant index_map, single-buffered).
# ---------------------------------------------------------------------------
def residual_kernel(x_ref, w1_ref, b1_ref, w2_ref, b2_ref, o_ref):
    x = x_ref[...]                                   # (tm, N), I/O dtype
    mxu_dt = w1_ref.dtype                            # f32 (exact) or bf16 (fast)
    contract_features = (((1,), (1,)), ((), ()))     # A @ B^T on the MXU

    h = lax.dot_general(x.astype(mxu_dt), w1_ref[...], contract_features,
                        preferred_element_type=jnp.float32) + b1_ref[...]
    h = _elu(h)                                      # f32 elementwise
    y = lax.dot_general(h.astype(mxu_dt), w2_ref[...], contract_features,
                        preferred_element_type=jnp.float32) + b2_ref[...]

    o_ref[...] = (x.astype(jnp.float32) + y).astype(o_ref.dtype)


def _resident_spec(shape):
    """BlockSpec for an operand whose block never changes across the grid."""
    idx = lambda i: (0, 0)
    try:
        # Single-buffered: constant block, no need for a second pipeline buffer.
        return pl.BlockSpec(shape, idx, pipeline_mode=pl.Buffered(1))
    except (TypeError, AttributeError):
        # Fallback for BlockSpec signatures without pipeline_mode.
        return pl.BlockSpec(shape, idx)


# ---------------------------------------------------------------------------
# Wrapper
# ---------------------------------------------------------------------------
def residual_forward(x, w1, b1, w2, b2, *, block_rows=512, use_bf16_matmul=None,
                     vmem_budget_bytes=48 << 20):
    """x: (..., N); w1, w2: (N, N) in PyTorch (out, in) layout; b1, b2: (N,)."""
    orig_shape = x.shape
    io_dtype = x.dtype
    N = orig_shape[-1]
    assert w1.shape == (N, N) and w2.shape == (N, N)

    x2d = x.reshape(-1, N)                 # dtype preserved (no forced f32)
    M = x2d.shape[0]

    # bf16 MXU operands only pay off when the contraction dim is large; the
    # small-N regime is HBM-bound, so keep exact f32 there.
    if use_bf16_matmul is None:
        use_bf16_matmul = N >= 256
    mxu_dtype = jnp.bfloat16 if use_bf16_matmul else jnp.float32

    io_bytes = jnp.dtype(io_dtype).itemsize
    w_bytes = 2 * N * N * jnp.dtype(mxu_dtype).itemsize + 2 * N * 4

    # Row tile: multiple of 8 sublanes, never larger than (8-rounded) M, shrunk
    # until the working set fits a conservative per-chip VMEM budget (v7x has
    # only 64 MiB / TC, so default budget is 48 MiB).
    m8 = _round_up(max(M, 1), 8)
    tm = max(8, min(_round_up(block_rows, 8), m8))

    def act_bytes(t):
        # x + out tiles double-buffered (I/O dtype) + f32 hidden/accum tiles.
        return 2 * (2 * t * N * io_bytes) + 2 * (t * N * 4)

    while tm > 8 and w_bytes + act_bytes(tm) > vmem_budget_bytes:
        tm = max(8, (tm // 2 // 8) * 8)

    m_pad = _round_up(m8, tm)              # pad by at most one row tile
    grid_m = m_pad // tm
    if m_pad != M:
        x2d = jnp.pad(x2d, ((0, m_pad - M), (0, 0)))

    w1_k = w1.astype(mxu_dtype)
    w2_k = w2.astype(mxu_dtype)
    b1_k = b1.reshape(1, N).astype(jnp.float32)
    b2_k = b2.reshape(1, N).astype(jnp.float32)

    cost = pl.CostEstimate(
        flops=int(2 * 2 * m_pad * N * N),          # two (N,N) matmuls / row
        transcendentals=int(m_pad * N),            # exp in ELU
        bytes_accessed=int(2 * m_pad * N * io_bytes + w_bytes),
    )

    vmem_limit = int(min(max(w_bytes + act_bytes(tm) + (2 << 20), 16 << 20),
                         64 << 20))

    out_pad = pl.pallas_call(
        residual_kernel,
        out_shape=jax.ShapeDtypeStruct((m_pad, N), io_dtype),
        grid=(grid_m,),
        in_specs=[
            pl.BlockSpec((tm, N), lambda i: (i, 0)),     # x row tile
            _resident_spec((N, N)),                      # w1 (resident)
            _resident_spec((1, N)),                      # b1
            _resident_spec((N, N)),                      # w2 (resident)
            _resident_spec((1, N)),                      # b2
        ],
        out_specs=pl.BlockSpec((tm, N), lambda i: (i, 0)),
        compiler_params=pltpu.CompilerParams(
            dimension_semantics=("parallel",),
            vmem_limit_bytes=vmem_limit),
        cost_estimate=cost,
    )(x2d, w1_k, b1_k, w2_k, b2_k)

    return out_pad[:M].reshape(orig_shape)


# ---------------------------------------------------------------------------
# Deterministic init matching nn.Linear defaults: U(-1/sqrt(in), 1/sqrt(in)),
# weights kept in the PyTorch (out, in) layout.
# ---------------------------------------------------------------------------
def init_linear(key, fan_in, fan_out):
    kw, kb = jax.random.split(key)
    bound = 1.0 / math.sqrt(fan_in)
    w = jax.random.uniform(kw, (fan_out, fan_in), jnp.float32, -bound, bound)
    b = jax.random.uniform(kb, (fan_out,), jnp.float32, -bound, bound)
    return w, b


def init_residual(key, n):
    k1, k2 = jax.random.split(key)
    w1, b1 = init_linear(k1, n, n)
    w2, b2 = init_linear(k2, n, n)
    return w1, b1, w2, b2


# ---------------------------------------------------------------------------
# Pure-JAX reference (mirrors the PyTorch module exactly)
# ---------------------------------------------------------------------------
def residual_ref(x, w1, b1, w2, b2):
    h = x @ w1.T + b1
    h = jnp.where(h > 0, h, jnp.expm1(jnp.minimum(h, 0.0)))
    return x + h @ w2.T + b2


if __name__ == "__main__":
    N = 32
    batch, seq = 2, 8

    key = jax.random.PRNGKey(0)
    k_data, k_param = jax.random.split(key)
    w1, b1, w2, b2 = init_residual(k_param, N)
    x = jax.random.normal(k_data, (batch, seq, N), jnp.float32)

    out = jax.block_until_ready(residual_forward(x, w1, b1, w2, b2))
    ref = residual_ref(x, w1, b1, w2, b2)

    assert out.shape == x.shape and out.dtype == x.dtype
    err = float(jnp.max(jnp.abs(out - ref)))
    assert jnp.allclose(out, ref, atol=1e-5, rtol=1e-5), \
        f"kernel mismatch vs reference (max abs err {err})"

    print("KERNEL_OK")
</pallas_src>

<mosaic_0001>
module attributes {stable_mosaic.version = 11 : i64} {
  func.func @residual_kernel(%arg0: i32, %arg1: memref<16x32xf32, #tpu.memory_space<vmem>>, %arg2: memref<32x32xf32, #tpu.memory_space<vmem>>, %arg3: memref<1x32xf32, #tpu.memory_space<vmem>>, %arg4: memref<32x32xf32, #tpu.memory_space<vmem>>, %arg5: memref<1x32xf32, #tpu.memory_space<vmem>>, %arg6: memref<16x32xf32, #tpu.memory_space<vmem>>) attributes {dimension_semantics = [#tpu.dimension_semantics<parallel>], iteration_bounds = array<i64: 1>, scalar_prefetch = 0 : i64, scratch_operands = 0 : i64, tpu.core_type = #tpu.core_type<tc>, window_params = [{transform_indices = @transform_0, window_bounds = array<i64: 16, 32>}, {pipeline_mode = #tpu.pipeline_mode<synchronous>, transform_indices = @transform_1, window_bounds = array<i64: 32, 32>}, {pipeline_mode = #tpu.pipeline_mode<synchronous>, transform_indices = @transform_2, window_bounds = array<i64: 1, 32>}, {pipeline_mode = #tpu.pipeline_mode<synchronous>, transform_indices = @transform_3, window_bounds = array<i64: 32, 32>}, {pipeline_mode = #tpu.pipeline_mode<synchronous>, transform_indices = @transform_4, window_bounds = array<i64: 1, 32>}, {transform_indices = @transform_5, window_bounds = array<i64: 16, 32>}]} {
    %c0 = arith.constant 0 : index
    %c0_0 = arith.constant 0 : index
    %0 = vector.load %arg1[%c0, %c0_0] : memref<16x32xf32, #tpu.memory_space<vmem>>, vector<16x32xf32>
    %c0_1 = arith.constant 0 : index
    %c0_2 = arith.constant 0 : index
    %1 = vector.load %arg2[%c0_1, %c0_2] : memref<32x32xf32, #tpu.memory_space<vmem>>, vector<32x32xf32>
    %cst = arith.constant dense<0.000000e+00> : vector<16x32xf32>
    %2 = tpu.matmul %0, %1, %cst {dimension_numbers = #tpu.dot_dimension_numbers<[1], [1], [0], [0], [0, 0, 1, 0], [], []>} : vector<16x32xf32>, vector<32x32xf32>, vector<16x32xf32> -> vector<16x32xf32>
    %c0_3 = arith.constant 0 : index
    %c0_4 = arith.constant 0 : index
    %3 = vector.load %arg3[%c0_3, %c0_4] : memref<1x32xf32, #tpu.memory_space<vmem>>, vector<1x32xf32>
    %4 = vector.broadcast %3 : vector<1x32xf32> to vector<16x32xf32>
    %5 = arith.addf %2, %4 : vector<16x32xf32>
    %cst_5 = arith.constant 0.000000e+00 : f32
    %6 = vector.broadcast %cst_5 : f32 to vector<16x32xf32>
    %7 = arith.cmpf ogt, %5, %6 : vector<16x32xf32>
    %cst_6 = arith.constant 0.000000e+00 : f32
    %8 = vector.broadcast %cst_6 : f32 to vector<16x32xf32>
    %9 = arith.minimumf %5, %8 : vector<16x32xf32>
    %10 = math.exp %9 : vector<16x32xf32>
    %cst_7 = arith.constant 1.000000e+00 : f32
    %11 = vector.broadcast %cst_7 : f32 to vector<16x32xf32>
    %12 = arith.subf %10, %11 : vector<16x32xf32>
    %13 = arith.select %7, %5, %12 : vector<16x32xi1>, vector<16x32xf32>
    %c0_8 = arith.constant 0 : index
    %c0_9 = arith.constant 0 : index
    %14 = vector.load %arg4[%c0_8, %c0_9] : memref<32x32xf32, #tpu.memory_space<vmem>>, vector<32x32xf32>
    %cst_10 = arith.constant dense<0.000000e+00> : vector<16x32xf32>
    %15 = tpu.matmul %13, %14, %cst_10 {dimension_numbers = #tpu.dot_dimension_numbers<[1], [1], [0], [0], [0, 0, 1, 0], [], []>} : vector<16x32xf32>, vector<32x32xf32>, vector<16x32xf32> -> vector<16x32xf32>
    %c0_11 = arith.constant 0 : index
    %c0_12 = arith.constant 0 : index
    %16 = vector.load %arg5[%c0_11, %c0_12] : memref<1x32xf32, #tpu.memory_space<vmem>>, vector<1x32xf32>
    %17 = vector.broadcast %16 : vector<1x32xf32> to vector<16x32xf32>
    %18 = arith.addf %15, %17 : vector<16x32xf32>
    %19 = arith.addf %0, %18 : vector<16x32xf32>
    %c0_13 = arith.constant 0 : index
    %c0_14 = arith.constant 0 : index
    %20 = vector.load %arg6[%c0_13, %c0_14] : memref<16x32xf32, #tpu.memory_space<vmem>>, vector<16x32xf32>
    tpu.vector_store %arg6[%c0_13, %c0_14], %19 {strides = array<i32>} : memref<16x32xf32, #tpu.memory_space<vmem>>, vector<16x32xf32>,
    return
  }
  func.func @transform_0(%arg0: i32) -> (i32, i32) {
    %c0_i32 = arith.constant 0 : i32
    %c0_i32_0 = arith.constant 0 : i32
    return %arg0, %c0_i32 : i32, i32
  }
  func.func @transform_1(%arg0: i32) -> (i32, i32) {
    %c0_i32 = arith.constant 0 : i32
    %c0_i32_0 = arith.constant 0 : i32
    %c0_i32_1 = arith.constant 0 : i32
    return %c0_i32, %c0_i32_0 : i32, i32
  }
  func.func @transform_2(%arg0: i32) -> (i32, i32) {
    %c0_i32 = arith.constant 0 : i32
    %c0_i32_0 = arith.constant 0 : i32
    %c0_i32_1 = arith.constant 0 : i32
    return %c0_i32, %c0_i32_0 : i32, i32
  }
  func.func @transform_3(%arg0: i32) -> (i32, i32) {
    %c0_i32 = arith.constant 0 : i32
    %c0_i32_0 = arith.constant 0 : i32
    %c0_i32_1 = arith.constant 0 : i32
    return %c0_i32, %c0_i32_0 : i32, i32
  }
  func.func @transform_4(%arg0: i32) -> (i32, i32) {
    %c0_i32 = arith.constant 0 : i32
    %c0_i32_0 = arith.constant 0 : i32
    %c0_i32_1 = arith.constant 0 : i32
    return %c0_i32, %c0_i32_0 : i32, i32
  }
  func.func @transform_5(%arg0: i32) -> (i32, i32) {
    %c0_i32 = arith.constant 0 : i32
    %c0_i32_0 = arith.constant 0 : i32
    return %arg0, %c0_i32 : i32, i32
  }
}

</mosaic_0001>

<bundles_post_ra>
// kernel: tpu_custom_call.1
= control target key start
LH: loop header
LB: loop body
LE: loop exit
PB: predicated region body
PF: predicated region fallthrough
CT: control target
= control target key end

     0   :  { %10 = vsyncpa [#allocation3], 0  ;;  %s622_s0 = inlined_call_operand.hbm [shape: f32[16,32], index: 0, kind: input, shape index: {}]   ;;  %s623_s1 = inlined_call_operand.hbm [shape: f32[32,32], index: 1, kind: input, shape index: {}]   ;;  %s624_s2 = inlined_call_operand.vmem [shape: f32[1,32], index: 2, kind: input, shape index: {}]   ;;  %s625_s3 = inlined_call_operand.hbm [shape: f32[32,32], index: 3, kind: input, shape index: {}]   ;;  %s626_s4 = inlined_call_operand.vmem [shape: f32[1,32], index: 4, kind: input, shape index: {}]   ;;  %s627_s5 = inlined_call_operand.hbm [shape: f32[16,32], index: 5, kind: output, shape index: {}]  }
   0x1   :  { %11 = vsyncpa [#allocation6], 0 }
   0x2   :  { %12 = vsyncpa [#allocation4], 0  ;;  %s485_s18 = smov [#allocation5]   ;;  %s486_s20 = smov [#allocation2]  }
   0x3   :  { %s30_s19 = sshll.u32 %s485_s18, 4  ;;  %s18_s21 = sshll.u32 %s486_s20, 4  ;;  %s31_s19 = int_to_ptr.vmem [resolvable:$true] %s30_s19  ;;  %s521_s21 = int_to_ptr.vmem [resolvable:$true] %s18_s21 }
   0x4   :  { %s391_s24 = scalar_lea.hbm %s623_s1, 512 }
   0x5   :  { %p392_p0 = scmp.ne.s32.totalorder %s623_s1, %s391_s24  ;;  %p395_p1 = scmp.lt.u32.totalorder %s391_s24, %s623_s1 }
   0x7   :  { %p397_p2 = pnand %p395_p1, %p392_p0 }
   0x9   :  { %400 = shalt.err (!%p397_p2)
}
   0xa   :  { %s401_s29 = scalar_lea.vmem %s31_s19, 512  ;;  %p406_p4 = scmp.lt.s32.totalorder %s31_s19, %s31_s19 }
   0xb   :  { %p402_p3 = scmp.ne.s32.totalorder %s31_s19, %s401_s29  ;;  %p407_p5 = scmp.lt.s32.totalorder %s401_s29, %s401_s29 }
   0xd   :  { %p408_p6 = por %p407_p5, %p406_p4 }
   0xf   :  { %p409_p7 = pnand %p408_p6, %p402_p3 }
  0x11   :  { %412 = shalt.err (!%p409_p7)
}
  0x12   :  { %s487_s30 = smov 128   ;;  %s488_s6 = smov 8  }
  0x13   :  { %36 = dma.hbm_to_vmem [thread:$0]  %s623_s1, 512, %s31_s19, [#allocation6], %s487_s30, %s487_s30, %s488_s6  }
  0x14   :  { %s413_s11 = scalar_lea.hbm %s622_s0, 256 }
  0x15   :  { %p414_p8 = scmp.ne.s32.totalorder %s622_s0, %s413_s11  ;;  %p417_p9 = scmp.lt.u32.totalorder %s413_s11, %s622_s0 }
  0x17   :  { %p419_p10 = pnand %p417_p9, %p414_p8 }
  0x19   :  { %422 = shalt.err (!%p419_p10)
}
  0x1a   :  { %s423_s16 = scalar_lea.vmem %s521_s21, 256  ;;  %p428_p12 = scmp.lt.s32.totalorder %s521_s21, %s521_s21 }
  0x1b   :  { %p424_p11 = scmp.ne.s32.totalorder %s521_s21, %s423_s16  ;;  %p429_p13 = scmp.lt.s32.totalorder %s423_s16, %s423_s16 }
  0x1d   :  { %p430_p0 = por %p429_p13, %p428_p12 }
  0x1f   :  { %p431_p1 = pnand %p430_p0, %p424_p11 }
  0x21   :  { %434 = shalt.err (!%p431_p1)
}
  0x22   :  { %24 = dma.hbm_to_vmem [thread:$0]  %s622_s0, 256, %s521_s21, [#allocation3], %s487_s30, %s487_s30, %s488_s6  }
  0x23   :  { %s489_s18 = smov [#allocation7]   ;;  %s435_s23 = scalar_lea.hbm %s625_s3, 512 }
  0x24   :  { %s44_s19 = sshll.u32 %s489_s18, 4  ;;  %p436_p2 = scmp.ne.s32.totalorder %s625_s3, %s435_s23  ;;  %s45_s19 = int_to_ptr.vmem [resolvable:$true] %s44_s19 }
  0x25   :  { %p439_p3 = scmp.lt.u32.totalorder %s435_s23, %s625_s3 }
  0x27   :  { %p441_p4 = pnand %p439_p3, %p436_p2 }
  0x29   :  { %444 = shalt.err (!%p441_p4)
}
  0x2a   :  { %s445_s28 = scalar_lea.vmem %s45_s19, 512  ;;  %p450_p6 = scmp.lt.s32.totalorder %s45_s19, %s45_s19 }
  0x2b   :  { %p446_p5 = scmp.ne.s32.totalorder %s45_s19, %s445_s28  ;;  %p451_p7 = scmp.lt.s32.totalorder %s445_s28, %s445_s28 }
  0x2d   :  { %p452_p8 = por %p451_p7, %p450_p6 }
  0x2f   :  { %p453_p9 = pnand %p452_p8, %p446_p5 }
  0x31   :  { %456 = shalt.err (!%p453_p9)
}
  0x32   :  { %50 = dma.hbm_to_vmem [thread:$0]  %s625_s3, 512, %s45_s19, [#allocation6], %s487_s30, %s487_s30, %s488_s6  }
  0x33   :  { %479 = dma.done.wait [#allocation3], 256  }
  0x34   :  { %480 = vsyncadd [#allocation3], 4294967040 }
  0x35   :  { %481 = dma.done.wait [#allocation6], 1024  }
  0x36   :  { %482 = vsyncadd [#allocation6], 4294966272  ;;  %vm75_vm0 = vcmask 261120   ;;  %v64_v1 = vld [vmem:[#allocation5] sm:$0xff]  ;;  %v65_v2 = vld [vmem:[#allocation5 + $0x8] sm:$0xff]  ;;  %s490_s8 = smov [#allocation8]  }
  0x37   :  { %vm575_vm1 = vmpackc.low %vm75_vm0, %vm75_vm0  ;;  %v66_v3 = vld [vmem:[#allocation5 + $0x10] sm:$0xff]  ;;  %v357_v4 = vpack.c.bf16 %v65_v2, %v64_v1  ;;  %v67_v5 = vld [vmem:[#allocation5 + $0x18] sm:$0xff]  ;;  %s294_s9 = sshll.u32 %s490_s8, 4  ;;  %s295_s9 = int_to_ptr.vmem [resolvable:$true] %s294_s9 }
  0x38   :  { %v62_v6 = vld [vmem:[#allocation2] sm:$0xff]  ;;  %v363_v7 = vpack.c.bf16 %v67_v5, %v66_v3  ;;  %v63_v8 = vld [vmem:[#allocation2 + $0x8] sm:$0xff]  ;;  %v181_v9 = vld [vmem:[#allocation7] sm:$0xff]  ;;  %s457_s10 = scalar_lea.vmem %s295_s9, 256  ;;  %p462_p11 = scmp.lt.s32.totalorder %s295_s9, %s295_s9 }
  0x39   :  { %343 = vmatprep.mubr.msk.f32.mxu0 %vm75_vm0, %v62_v6  ;;  %359 = vmatprep.subr.msk.bf16.mxu0 %vm575_vm1, %v357_v4  ;;  %v182_v10 = vld [vmem:[#allocation7 + $0x8] sm:$0xff]  ;;  %v183_v12 = vld [vmem:[#allocation7 + $0x10] sm:$0xff]  ;;  %v184_v13 = vld [vmem:[#allocation7 + $0x18] sm:$0xff]  ;;  %p458_p10 = scmp.ne.s32.totalorder %s295_s9, %s457_s10  ;;  %p463_p12 = scmp.lt.s32.totalorder %s457_s10, %s457_s10 }
  0x3a   :  { %362 = vmatpush3.bf16.xpose.msk.msra.mxu0 %vm575_vm1, %v357_v4  ;;  %v369_v11 = vpack.c.bf16 %v182_v10, %v181_v9  ;;  %v375_v14 = vpack.c.bf16 %v184_v13, %v183_v12  ;;  %v307_v15 = vld [vmem:[%s624_s2] ss:$0 sm:$0xff] }
  0x3b   :  { %365 = vmatprep.subr.msk.bf16.mxu0 %vm575_vm1, %v363_v7  ;;  %v316_v30 = vld [vmem:[%s626_s4] ss:$0 sm:$0xff]  ;;  %p464_p13 = por %p463_p12, %p462_p11 }
  0x3c   :  { %371 = vmatprep.subr.msk.bf16.mxu1 %vm575_vm1, %v369_v11 }
  0x3d   :  { %374 = vmatpush3.bf16.xpose.msk.msra.mxu1 %vm575_vm1, %v369_v11  ;;  %p465_p0 = pnand %p464_p13, %p458_p10 }
  0x3e   :  { %377 = vmatprep.subr.msk.bf16.mxu1 %vm575_vm1, %v375_v14 }
  0x42   :  { %368 = vmatpush3.bf16.xpose.msk.msra.mxu0 %vm575_vm1, %v363_v7 }
  0x45   :  { %380 = vmatpush3.bf16.xpose.msk.msra.mxu1 %vm575_vm1, %v375_v14 }
  0x49   :  { %344 = vmatmul.mubr.msk.f32.vlgmr.msra.gmra.mrb[0].mxu0 %vm75_vm0, %v63_v8 }
 0x11c   :  { %v345_v16 = vpop.f32.mrb[0].mxu0 }
 0x11d   :  { %v166_v17 = vadd.f32 %v345_v16, %v307_v15  ;;  %v160_v18 = vpop.f32.mrb[1].mxu0 }
 0x11e   :  { %v161_v19 = vadd.f32 %v307_v15, %v160_v18 }
 0x11f   :  { %v172_v20 = vmin.f32 %v166_v17, 0.0  ;;  %vm170_vm3 = vcmp.gt.f32.partialorder %v166_v17, 0.0 }
 0x120   :  { %v171_v21 = vmin.f32 %v161_v19, 0.0  ;;  %vm169_vm2 = vcmp.gt.f32.partialorder %v161_v19, 0.0 }
 0x121   :  { %v175_v22 = vmul.f32 1.442695, %v172_v20 }
 0x122   :  { %v173_v23 = vmul.f32 1.442695, %v171_v21 }
 0x123   :  { %387 = vpow2.f32 %v175_v22 }
 0x124   :  { %389 = vpow2.f32 %v173_v23 }
 0x12d   :  { %v388_v24 = vpop.eup %387 }
 0x12e   :  { %v390_v25 = vpop.eup %389  ;;  %v315_v26 = vadd.f32 -1.0, %v388_v24 }
 0x12f   :  { %v314_v27 = vadd.f32 -1.0, %v390_v25 }
 0x130   :  { %v180_v29 = vsel %vm170_vm3, %v166_v17, %v315_v26 }
 0x131   :  { %v179_v28 = vsel %vm169_vm2, %v161_v19, %v314_v27 }
 0x132   :  { %354 = vmatprep.mubr.msk.f32.mxu1 %vm75_vm0, %v179_v28 }
 0x133   :  { %355 = vmatmul.mubr.msk.f32.vlgmr.msra.gmra.mrb[0].mxu1 %vm75_vm0, %v180_v29 }
 0x206   :  { %v356_v31 = vpop.f32.mrb[0].mxu1 }
 0x207   :  { %v282_v32 = vadd.f32 %v356_v31, %v316_v30  ;;  %v276_v33 = vpop.f32.mrb[1].mxu1 }
 0x208   :  { %v277_v34 = vadd.f32 %v316_v30, %v276_v33 }
 0x209   :  { %v286_v35 = vadd.f32 %v282_v32, %v63_v8 }
 0x20a   :  { %v285_v36 = vadd.f32 %v277_v34, %v62_v6 }
 0x20b   :  { %288 = vst.msk [vmem:[#allocation8 + $0x8] sm:$0xff] %vm75_vm0, %v286_v35 }
 0x20c   :  { %287 = vst.msk [vmem:[#allocation8] sm:$0xff] %vm75_vm0, %v285_v36 }
 0x20d   :  { %468 = shalt.err (!%p465_p0)
}
 0x20e   :  { %s469_s12 = scalar_lea.hbm %s627_s5, 256 }
 0x20f   :  { %p470_p1 = scmp.ne.s32.totalorder %s627_s5, %s469_s12  ;;  %p473_p2 = scmp.lt.u32.totalorder %s469_s12, %s627_s5 }
 0x211   :  { %p475_p3 = pnand %p473_p2, %p470_p1 }
 0x213   :  { %478 = shalt.err (!%p475_p3)
}
 0x214   :  { %300 = dma.vmem_to_hbm [thread:$0]  %s295_s9, 256, %s627_s5, [#allocation4], %s487_s30, %s487_s30, %s488_s6  }
 0x215   :  { %483 = dma.done.wait [#allocation4], 256  }
 0x216   :  { %484 = vsyncadd [#allocation4], 4294967040 }
 0x217   :  { %304 = vsyncpa [#allocation3], 1 }
 0x218   :  { %305 = vsyncpa [#allocation6], 1 }
 0x219   :  { %306 = vsyncpa [#allocation4], 1 }

</bundles_post_ra>
